<compile_context>
chip_gen: v5e
topology: v5e:2x2
jax: 0.10.0
libtpu: 0.0.40
codegen_flags: <defaults>
</compile_context>

<pallas_src>
import jax
import jax.numpy as jnp
from jax.experimental import pallas as pl
from jax.experimental.pallas import tpu as pltpu  # noqa: F401  (TPU backend)


def _full_spec(shape):
    # Whole array as one VMEM block (no grid).
    return pl.BlockSpec(shape, lambda: (0,) * len(shape))


def _make_fused_gcn_kernel(out_feats_list):
    """Build a kernel computing all GCN layers + tanh + concat in one body."""
    n_layers = len(out_feats_list)
    offsets = []
    off = 0
    for f in out_feats_list:
        offsets.append(off)
        off += f

    def kernel(a_ref, x_ref, *refs):
        o_ref = refs[-1]
        wb_refs = refs[:-1]
        a = a_ref[...]
        h = x_ref[...]
        for layer in range(n_layers):
            w = wb_refs[2 * layer][...]
            b = wb_refs[2 * layer + 1][...]
            # Message passing with folded normalization: (A_hat @ H) @ W + b
            agg = jnp.dot(a, h, preferred_element_type=jnp.float32)
            h = jnp.tanh(
                jnp.dot(agg, w, preferred_element_type=jnp.float32) + b
            )
            f = out_feats_list[layer]
            # Static, 128-aligned column slice of the concatenated output.
            o_ref[:, offsets[layer]:offsets[layer] + f] = h.astype(o_ref.dtype)

    return kernel


def graph_encoder_forward(a_hat, node_feats, params):
    """Fused forward: concat([tanh(A_hat @ H @ W_l + b_l) for each layer], -1)."""
    n = node_feats.shape[0]
    out_feats = tuple(int(p["w"].shape[1]) for p in params)
    total_out = sum(out_feats)

    kernel = _make_fused_gcn_kernel(out_feats)

    flat_inputs = [a_hat, node_feats]
    in_specs = [_full_spec(a_hat.shape), _full_spec(node_feats.shape)]
    for p in params:
        flat_inputs += [p["w"], p["b"]]
        in_specs += [_full_spec(p["w"].shape), _full_spec(p["b"].shape)]

    return pl.pallas_call(
        kernel,
        out_shape=jax.ShapeDtypeStruct((n, total_out), node_feats.dtype),
        in_specs=in_specs,
        out_specs=_full_spec((n, total_out)),
    )(*flat_inputs)


def build_normalized_adjacency(num_nodes, src, dst, edge_weight):
    """Dense A_hat = D_in^{-1/2} @ A_w @ D_out^{-1/2} (DGL GraphConv, norm='both').

    A_w[dst, src] = edge_weight (summed over duplicate edges); degrees are the
    UNWEIGHTED in/out edge counts, clamped to >= 1 (DGL behavior).
    """
    edge_weight = edge_weight.astype(jnp.float32)
    a = jnp.zeros((num_nodes, num_nodes), jnp.float32).at[dst, src].add(edge_weight)
    ones = jnp.ones_like(edge_weight)
    out_deg = jnp.zeros((num_nodes,), jnp.float32).at[src].add(ones)
    in_deg = jnp.zeros((num_nodes,), jnp.float32).at[dst].add(ones)
    out_norm = jax.lax.rsqrt(jnp.maximum(out_deg, 1.0))
    in_norm = jax.lax.rsqrt(jnp.maximum(in_deg, 1.0))
    return in_norm[:, None] * a * out_norm[None, :]


def init_graph_encoder_params(key, in_features, list_out_features):
    """Mirror DGL GraphConv parameter shapes: W is [in_feats, out_feats]."""
    params = []
    fan_in = in_features
    for f_out in list_out_features:
        key, kw, kb = jax.random.split(key, 3)
        limit = float(jnp.sqrt(6.0 / (fan_in + f_out)))  # xavier_uniform (DGL default)
        w = jax.random.uniform(kw, (fan_in, f_out), jnp.float32, -limit, limit)
        b = jax.random.uniform(kb, (1, f_out), jnp.float32, -0.1, 0.1)
        params.append(dict(w=w, b=b))
        fan_in = f_out
    return params


if __name__ == "__main__":
    # Small example consistent with the module's forward.
    num_nodes = 64
    in_features = 64
    list_out_features = [128, 128, 128]  # multiples of 128 -> lane-dense concat output
    # list_dropout = [0.1, 0.1, 0.1]     # eval mode -> identity (last one dropped in __init__)

    key = jax.random.PRNGKey(0)
    key, kx, ks, kd, kew = jax.random.split(key, 5)

    # Deterministic graph: a ring (guarantees in-degree >= 1, i.e. satisfies
    # allow_zero_in_degree=False) plus extra random edges with random weights.
    ring_src = jnp.arange(num_nodes, dtype=jnp.int32)
    ring_dst = (ring_src + 1) % num_nodes
    extra_src = jax.random.randint(ks, (128,), 0, num_nodes, dtype=jnp.int32)
    extra_off = jax.random.randint(kd, (128,), 1, num_nodes, dtype=jnp.int32)
    extra_dst = (extra_src + extra_off) % num_nodes
    src = jnp.concatenate([ring_src, extra_src])
    dst = jnp.concatenate([ring_dst, extra_dst])
    edge_weight = jax.random.uniform(kew, (src.shape[0],), jnp.float32, 0.1, 1.0)

    node_feats = jax.random.normal(kx, (num_nodes, in_features), jnp.float32)
    a_hat = build_normalized_adjacency(num_nodes, src, dst, edge_weight)
    params = init_graph_encoder_params(key, in_features, list_out_features)

    fwd = jax.jit(graph_encoder_forward)
    out = jax.block_until_ready(fwd(a_hat, node_feats, params))
    assert out.shape == (num_nodes, sum(list_out_features)), out.shape

    # Plain-JAX reference (same math as DGL GraphConv eval forward + tanh + concat).
    h = node_feats
    ref_outs = []
    for p in params:
        agg = jnp.dot(a_hat, h, precision=jax.lax.Precision.HIGHEST)
        h = jnp.tanh(jnp.dot(agg, p["w"], precision=jax.lax.Precision.HIGHEST) + p["b"])
        ref_outs.append(h)
    ref = jnp.concatenate(ref_outs, axis=-1)
    assert jnp.allclose(out, ref, atol=1e-4, rtol=1e-4), float(jnp.max(jnp.abs(out - ref)))

    print("KERNEL_OK")
</pallas_src>

<mosaic_0001>
module attributes {stable_mosaic.version = 11 : i64} {
  func.func @kernel(%arg0: memref<64x64xf32, #tpu.memory_space<vmem>>, %arg1: memref<64x64xf32, #tpu.memory_space<vmem>>, %arg2: memref<64x128xf32, #tpu.memory_space<vmem>>, %arg3: memref<1x128xf32, #tpu.memory_space<vmem>>, %arg4: memref<128x128xf32, #tpu.memory_space<vmem>>, %arg5: memref<1x128xf32, #tpu.memory_space<vmem>>, %arg6: memref<128x128xf32, #tpu.memory_space<vmem>>, %arg7: memref<1x128xf32, #tpu.memory_space<vmem>>, %arg8: memref<64x384xf32, #tpu.memory_space<vmem>>) attributes {dimension_semantics = [], scalar_prefetch = 0 : i64, scratch_operands = 0 : i64, tpu.core_type = #tpu.core_type<tc>} {
    %c0 = arith.constant 0 : index
    %c0_0 = arith.constant 0 : index
    %0 = vector.load %arg0[%c0, %c0_0] : memref<64x64xf32, #tpu.memory_space<vmem>>, vector<64x64xf32>
    %c0_1 = arith.constant 0 : index
    %c0_2 = arith.constant 0 : index
    %1 = vector.load %arg1[%c0_1, %c0_2] : memref<64x64xf32, #tpu.memory_space<vmem>>, vector<64x64xf32>
    %c0_3 = arith.constant 0 : index
    %c0_4 = arith.constant 0 : index
    %2 = vector.load %arg2[%c0_3, %c0_4] : memref<64x128xf32, #tpu.memory_space<vmem>>, vector<64x128xf32>
    %c0_5 = arith.constant 0 : index
    %c0_6 = arith.constant 0 : index
    %3 = vector.load %arg3[%c0_5, %c0_6] : memref<1x128xf32, #tpu.memory_space<vmem>>, vector<1x128xf32>
    %cst = arith.constant dense<0.000000e+00> : vector<64x64xf32>
    %4 = tpu.matmul %0, %1, %cst {dimension_numbers = #tpu.dot_dimension_numbers<[1], [0], [0], [1], [0, 0, 1, 1], [], []>} : vector<64x64xf32>, vector<64x64xf32>, vector<64x64xf32> -> vector<64x64xf32>
    %cst_7 = arith.constant dense<0.000000e+00> : vector<64x128xf32>
    %5 = tpu.matmul %4, %2, %cst_7 {dimension_numbers = #tpu.dot_dimension_numbers<[1], [0], [0], [1], [0, 0, 1, 1], [], []>} : vector<64x64xf32>, vector<64x128xf32>, vector<64x128xf32> -> vector<64x128xf32>
    %6 = vector.broadcast %3 : vector<1x128xf32> to vector<64x128xf32>
    %7 = arith.addf %5, %6 : vector<64x128xf32>
    %8 = math.tanh %7 : vector<64x128xf32>
    %c0_8 = arith.constant 0 : index
    %c0_9 = arith.constant 0 : index
    %9 = vector.load %arg8[%c0_8, %c0_9] : memref<64x384xf32, #tpu.memory_space<vmem>>, vector<64x128xf32>
    tpu.vector_store %arg8[%c0_8, %c0_9], %8 {strides = array<i32>} : memref<64x384xf32, #tpu.memory_space<vmem>>, vector<64x128xf32>,
    %c0_10 = arith.constant 0 : index
    %c0_11 = arith.constant 0 : index
    %10 = vector.load %arg4[%c0_10, %c0_11] : memref<128x128xf32, #tpu.memory_space<vmem>>, vector<128x128xf32>
    %c0_12 = arith.constant 0 : index
    %c0_13 = arith.constant 0 : index
    %11 = vector.load %arg5[%c0_12, %c0_13] : memref<1x128xf32, #tpu.memory_space<vmem>>, vector<1x128xf32>
    %cst_14 = arith.constant dense<0.000000e+00> : vector<64x128xf32>
    %12 = tpu.matmul %0, %8, %cst_14 {dimension_numbers = #tpu.dot_dimension_numbers<[1], [0], [0], [1], [0, 0, 1, 1], [], []>} : vector<64x64xf32>, vector<64x128xf32>, vector<64x128xf32> -> vector<64x128xf32>
    %cst_15 = arith.constant dense<0.000000e+00> : vector<64x128xf32>
    %13 = tpu.matmul %12, %10, %cst_15 {dimension_numbers = #tpu.dot_dimension_numbers<[1], [0], [0], [1], [0, 0, 1, 1], [], []>} : vector<64x128xf32>, vector<128x128xf32>, vector<64x128xf32> -> vector<64x128xf32>
    %14 = vector.broadcast %11 : vector<1x128xf32> to vector<64x128xf32>
    %15 = arith.addf %13, %14 : vector<64x128xf32>
    %16 = math.tanh %15 : vector<64x128xf32>
    %c0_16 = arith.constant 0 : index
    %c128 = arith.constant 128 : index
    %17 = vector.load %arg8[%c0_16, %c128] : memref<64x384xf32, #tpu.memory_space<vmem>>, vector<64x128xf32>
    tpu.vector_store %arg8[%c0_16, %c128], %16 {strides = array<i32>} : memref<64x384xf32, #tpu.memory_space<vmem>>, vector<64x128xf32>,
    %c0_17 = arith.constant 0 : index
    %c0_18 = arith.constant 0 : index
    %18 = vector.load %arg6[%c0_17, %c0_18] : memref<128x128xf32, #tpu.memory_space<vmem>>, vector<128x128xf32>
    %c0_19 = arith.constant 0 : index
    %c0_20 = arith.constant 0 : index
    %19 = vector.load %arg7[%c0_19, %c0_20] : memref<1x128xf32, #tpu.memory_space<vmem>>, vector<1x128xf32>
    %cst_21 = arith.constant dense<0.000000e+00> : vector<64x128xf32>
    %20 = tpu.matmul %0, %16, %cst_21 {dimension_numbers = #tpu.dot_dimension_numbers<[1], [0], [0], [1], [0, 0, 1, 1], [], []>} : vector<64x64xf32>, vector<64x128xf32>, vector<64x128xf32> -> vector<64x128xf32>
    %cst_22 = arith.constant dense<0.000000e+00> : vector<64x128xf32>
    %21 = tpu.matmul %20, %18, %cst_22 {dimension_numbers = #tpu.dot_dimension_numbers<[1], [0], [0], [1], [0, 0, 1, 1], [], []>} : vector<64x128xf32>, vector<128x128xf32>, vector<64x128xf32> -> vector<64x128xf32>
    %22 = vector.broadcast %19 : vector<1x128xf32> to vector<64x128xf32>
    %23 = arith.addf %21, %22 : vector<64x128xf32>
    %24 = math.tanh %23 : vector<64x128xf32>
    %c0_23 = arith.constant 0 : index
    %c256 = arith.constant 256 : index
    %25 = vector.load %arg8[%c0_23, %c256] : memref<64x384xf32, #tpu.memory_space<vmem>>, vector<64x128xf32>
    tpu.vector_store %arg8[%c0_23, %c256], %24 {strides = array<i32>} : memref<64x384xf32, #tpu.memory_space<vmem>>, vector<64x128xf32>,
    return
  }
}

</mosaic_0001>

<bundles_post_ra>
// kernel: graph_encoder_forward.1
= control target key start
LH: loop header
LB: loop body
LE: loop exit
PB: predicated region body
PF: predicated region fallthrough
CT: control target
= control target key end

     0   :  { %13 = vsyncpa [#allocation3], 0  ;;  %s963_s0 = inlined_call_operand.hbm [shape: f32[64,64], index: 0, kind: input, shape index: {}]   ;;  %s964_s1 = inlined_call_operand.hbm [shape: f32[64,64], index: 1, kind: input, shape index: {}]   ;;  %s965_s2 = inlined_call_operand.hbm [shape: f32[64,128], index: 2, kind: input, shape index: {}]   ;;  %s966_s3 = inlined_call_operand.vmem [shape: f32[1,128], index: 3, kind: input, shape index: {}]   ;;  %s967_s4 = inlined_call_operand.hbm [shape: f32[128,128], index: 4, kind: input, shape index: {}]   ;;  %s968_s5 = inlined_call_operand.vmem [shape: f32[1,128], index: 5, kind: input, shape index: {}]   ;;  %s969_s6 = inlined_call_operand.hbm [shape: f32[128,128], index: 6, kind: input, shape index: {}]   ;;  %s970_s7 = inlined_call_operand.vmem [shape: f32[1,128], index: 7, kind: input, shape index: {}]   ;;  %s971_s8 = inlined_call_operand.hbm [shape: f32[64,384], index: 8, kind: output, shape index: {}]  }
   0x1   :  { %14 = vsyncpa [#allocation6], 0 }
   0x2   :  { %15 = vsyncpa [#allocation9], 0 }
   0x3   :  { %16 = vsyncpa [#allocation4], 0  ;;  %s34_s29 = sshll.u32 %s964_s1, 4  ;;  %s809_s30 = smov [#allocation5]   ;;  %s35_s29 = int_to_ptr.hbm [resolvable:$true] %s34_s29 }
   0x4   :  { %s36_s9 = sshll.u32 %s809_s30, 4  ;;  %s62_s12 = sshll.u32 %s967_s4, 4  ;;  %s37_s9 = int_to_ptr.vmem [resolvable:$true] %s36_s9  ;;  %s63_s12 = int_to_ptr.hbm [resolvable:$true] %s62_s12 }
   0x5   :  { %s810_s13 = smov 128   ;;  %s811_s14 = smov 8  }
   0x6   :  { %42 = dma.hbm_to_vmem [thread:$0]  %s35_s29, 1024, %s37_s9, [#allocation6], %s810_s13, %s810_s13, %s811_s14  }
   0x7   :  { %s812_s15 = smov [#allocation8]   ;;  %s21_s19 = sshll.u32 %s963_s0, 4  ;;  %s22_s19 = int_to_ptr.hbm [resolvable:$true] %s21_s19 }
   0x8   :  { %s64_s16 = sshll.u32 %s812_s15, 4  ;;  %s47_s21 = sshll.u32 %s965_s2, 4  ;;  %s65_s16 = int_to_ptr.vmem [resolvable:$true] %s64_s16  ;;  %s48_s21 = int_to_ptr.hbm [resolvable:$true] %s47_s21 }
   0x9   :  { %70 = dma.hbm_to_vmem [thread:$0]  %s63_s12, 2048, %s65_s16, [#allocation9], %s810_s13, %s810_s13, %s811_s14  }
   0xa   :  { %s813_s22 = smov [#allocation2]   ;;  %s814_s4 = smov [#allocation7]  }
   0xb   :  { %s23_s23 = sshll.u32 %s813_s22, 4  ;;  %s49_s24 = sshll.u32 %s814_s4, 4  ;;  %s24_s23 = int_to_ptr.vmem [resolvable:$true] %s23_s23  ;;  %s50_s24 = int_to_ptr.vmem [resolvable:$true] %s49_s24 }
   0xc   :  { %29 = dma.hbm_to_vmem [thread:$0]  %s22_s19, 1024, %s24_s23, [#allocation3], %s810_s13, %s810_s13, %s811_s14  }
   0xd   :  { %s77_s27 = sshll.u32 %s969_s6, 4  ;;  %s815_s0 = smov [#allocation10]   ;;  %s78_s27 = int_to_ptr.hbm [resolvable:$true] %s77_s27 }
   0xe   :  { %55 = dma.hbm_to_vmem [thread:$0]  %s48_s21, 1024, %s50_s24, [#allocation6], %s810_s13, %s810_s13, %s811_s14  }
   0xf   :  { %s79_s28 = sshll.u32 %s815_s0, 4  ;;  %s80_s28 = int_to_ptr.vmem [resolvable:$true] %s79_s28 }
  0x10   :  { %85 = dma.hbm_to_vmem [thread:$0]  %s78_s27, 2048, %s80_s28, [#allocation9], %s810_s13, %s810_s13, %s811_s14  }
  0x11   :  { %801 = dma.done.wait [#allocation3], 1024  }
  0x12   :  { %802 = vsyncadd [#allocation3], 4294966272 }
  0x13   :  { %803 = dma.done.wait [#allocation6], 2048  }
  0x14   :  { %804 = vsyncadd [#allocation6], 4294965248 }
  0x15   :  { %805 = dma.done.wait [#allocation9], 4096  }
  0x16   :  { %806 = vsyncadd [#allocation9], 4294963200  ;;  %v123_v0 = vld [vmem:[#allocation5 + $0x38] sm:$0xff]  ;;  %v122_v1 = vld [vmem:[#allocation5 + $0x30] sm:$0xff]  ;;  %vm133_vm0 = vcmask 523264   ;;  %s525_s12 = sshll.u32 %s971_s8, 4  ;;  %s526_s12 = int_to_ptr.hbm [resolvable:$true] %s525_s12 }
  0x17   :  { %166 = vmatpush.msra.mxu0 %v123_v0  ;;  %572 = vmatpush.msra.mxu2 %v123_v0  ;;  %v121_v2 = vld [vmem:[#allocation5 + $0x28] sm:$0xff]  ;;  %v120_v3 = vld [vmem:[#allocation5 + $0x20] sm:$0xff]  ;;  %v119_v4 = vld [vmem:[#allocation5 + $0x18] sm:$0xff]  ;;  %s817_s13 = smov 384   ;;  %s818_s14 = smov 24  }
  0x18   :  { %v118_v5 = vld [vmem:[#allocation5 + $0x10] sm:$0xff]  ;;  %v117_v6 = vld [vmem:[#allocation5 + $0x8] sm:$0xff]  ;;  %v116_v7 = vld [vmem:[#allocation5] sm:$0xff] }
  0x19   :  { %167 = vmatpush.msra.mxu0 %v122_v1  ;;  %573 = vmatpush.msra.mxu2 %v122_v1  ;;  %v879_v8 = vld [vmem:[#allocation2] sm:$0xff]  ;;  %v883_v9 = vld [vmem:[#allocation2 + $0x28] sm:$0xff]  ;;  %v131_v10 = vld [vmem:[#allocation7 + $0x38] sm:$0xff] }
  0x1a   :  { %v130_v11 = vld [vmem:[#allocation7 + $0x30] sm:$0xff]  ;;  %234 = vmatpush.msra.mxu1 %v131_v10  ;;  %580 = vmatpush.msra.mxu3 %v131_v10  ;;  %v129_v12 = vld [vmem:[#allocation7 + $0x28] sm:$0xff]  ;;  %v128_v14 = vld [vmem:[#allocation7 + $0x20] sm:$0xff] }
  0x1b   :  { %168 = vmatpush.msra.mxu0 %v121_v2  ;;  %574 = vmatpush.msra.mxu2 %v121_v2  ;;  %v887_v13 = vld [vmem:[#allocation2 + $0x8] sm:$0xff]  ;;  %v889_v15 = vld [vmem:[#allocation2 + $0x30] sm:$0xff]  ;;  %v127_v16 = vld [vmem:[#allocation7 + $0x18] sm:$0xff] }
  0x1c   :  { %235 = vmatpush.msra.mxu1 %v130_v11  ;;  %581 = vmatpush.msra.mxu3 %v130_v11  ;;  %v126_v17 = vld [vmem:[#allocation7 + $0x10] sm:$0xff]  ;;  %v125_v18 = vld [vmem:[#allocation7 + $0x8] sm:$0xff]  ;;  %v897_v20 = vld [vmem:[#allocation2 + $0x38] sm:$0xff] }
  0x1d   :  { %169 = vmatpush.msra.mxu0 %v120_v3  ;;  %575 = vmatpush.msra.mxu2 %v120_v3  ;;  %v895_v19 = vld [vmem:[#allocation2 + $0x10] sm:$0xff]  ;;  %v903_v21 = vld [vmem:[#allocation2 + $0x18] sm:$0xff]  ;;  %v907_v22 = vld [vmem:[#allocation2 + $0x20] sm:$0xff] }
  0x1e   :  { %236 = vmatpush.msra.mxu1 %v129_v12  ;;  %582 = vmatpush.msra.mxu3 %v129_v12  ;;  %v124_v23 = vld [vmem:[#allocation7] sm:$0xff]  ;;  %v298_v57 = vld [vmem:[#allocation8 + $0x78] sm:$0xff]  ;;  %v297_v58 = vld [vmem:[#allocation8 + $0x70] sm:$0xff] }
  0x1f   :  { %170 = vmatpush.msra.mxu0 %v119_v4  ;;  %576 = vmatpush.msra.mxu2 %v119_v4  ;;  %v606_v32 = vld [vmem:[%s966_s3] ss:$0 sm:$0xff]  ;;  %v296_v59 = vld [vmem:[#allocation8 + $0x68] sm:$0xff]  ;;  %v294_v61 = vld [vmem:[#allocation8 + $0x58] sm:$0xff] }
  0x20   :  { %237 = vmatpush.msra.mxu1 %v128_v14  ;;  %583 = vmatpush.msra.mxu3 %v128_v14  ;;  %v295_v60 = vld [vmem:[#allocation8 + $0x60] sm:$0xff]  ;;  %v293_v62 = vld [vmem:[#allocation8 + $0x50] sm:$0xff]  ;;  %v292_v63 = vld [vmem:[#allocation8 + $0x48] sm:$0xff] }
  0x21   :  { %171 = vmatpush.msra.mxu0 %v118_v5  ;;  %577 = vmatpush.msra.mxu2 %v118_v5  ;;  %v291_v0 = vld [vmem:[#allocation8 + $0x40] sm:$0xff]  ;;  %v290_v1 = vld [vmem:[#allocation8 + $0x38] sm:$0xff]  ;;  %v289_v2 = vld [vmem:[#allocation8 + $0x30] sm:$0xff] }
  0x22   :  { %238 = vmatpush.msra.mxu1 %v127_v16  ;;  %584 = vmatpush.msra.mxu3 %v127_v16  ;;  %v288_v3 = vld [vmem:[#allocation8 + $0x28] sm:$0xff]  ;;  %v287_v4 = vld [vmem:[#allocation8 + $0x20] sm:$0xff]  ;;  %v286_v5 = vld [vmem:[#allocation8 + $0x18] sm:$0xff] }
  0x23   :  { %172 = vmatpush.msra.mxu0 %v117_v6  ;;  %578 = vmatpush.msra.mxu2 %v117_v6  ;;  %v285_v6 = vld [vmem:[#allocation8 + $0x10] sm:$0xff]  ;;  %v283_v10 = vld [vmem:[#allocation8] sm:$0xff] }
  0x24   :  { %239 = vmatpush.msra.mxu1 %v126_v17  ;;  %585 = vmatpush.msra.mxu3 %v126_v17 }
  0x25   :  { %173 = vmatpush.msra.mxu0 %v116_v7  ;;  %579 = vmatpush.msra.mxu2 %v116_v7  ;;  %v284_v7 = vld [vmem:[#allocation8 + $0x8] sm:$0xff] }
  0x26   :  { %540 = vmatmul.msk.f32.vlgmr.msra.gmra.mxu0 %vm133_vm0, %v879_v8  ;;  %545 = vmatmul.msk.f32.vlgmr.msra.gmra.mxu2 %vm133_vm0, %v883_v9 }
  0x27   :  { %240 = vmatpush.msra.mxu1 %v125_v18  ;;  %586 = vmatpush.msra.mxu3 %v125_v18 }
  0x29   :  { %241 = vmatpush.msra.mxu1 %v124_v23  ;;  %587 = vmatpush.msra.mxu3 %v124_v23 }
  0x2b   :  { %344 = vmatpush.msrb.mxu3 %v298_v57  ;;  %v405_v57 = vld [vmem:[#allocation10 + $0x20] sm:$0xff] }
  0x2d   :  { %345 = vmatpush.msrb.mxu3 %v297_v58  ;;  %v404_v58 = vld [vmem:[#allocation10 + $0x18] sm:$0xff] }
  0x2e   :  { %541 = vmatmul.msk.f32.gmra.mxu0 %vm133_vm0, %v887_v13  ;;  %546 = vmatmul.msk.f32.gmra.mxu2 %vm133_vm0, %v889_v15 }
  0x2f   :  { %346 = vmatpush.msrb.mxu3 %v296_v59  ;;  %v402_v59 = vld [vmem:[#allocation10 + $0x8] sm:$0xff] }
  0x31   :  { %347 = vmatpush.msrb.mxu3 %v295_v60  ;;  %v401_v60 = vld [vmem:[#allocation10] sm:$0xff] }
  0x33   :  { %348 = vmatpush.msrb.mxu3 %v294_v61 }
  0x35   :  { %349 = vmatpush.msrb.mxu3 %v293_v62 }
  0x36   :  { %542 = vmatmul.msk.f32.gmra.mxu0 %vm133_vm0, %v895_v19  ;;  %547 = vmatmul.msk.f32.gmra.mxu2 %vm133_vm0, %v897_v20 }
  0x37   :  { %350 = vmatpush.msrb.mxu3 %v292_v63 }
  0x39   :  { %351 = vmatpush.msrb.mxu3 %v291_v0 }
  0x3b   :  { %352 = vmatpush.msrb.mxu3 %v290_v1 }
  0x3d   :  { %353 = vmatpush.msrb.mxu3 %v289_v2 }
  0x3e   :  { %543 = vmatmul.msk.f32.gmra.mxu0 %vm133_vm0, %v903_v21 }
  0x3f   :  { %354 = vmatpush.msrb.mxu3 %v288_v3 }
  0x41   :  { %355 = vmatpush.msrb.mxu3 %v287_v4 }
  0x43   :  { %356 = vmatpush.msrb.mxu3 %v286_v5 }
  0x45   :  { %357 = vmatpush.msrb.mxu3 %v285_v6 }
  0x46   :  { %544 = vmatmul.msk.f32.gmra.mxu0 %vm133_vm0, %v907_v22 }
  0x47   :  { %358 = vmatpush.msrb.mxu3 %v284_v7 }
  0x49   :  { %359 = vmatpush.msrb.mxu3 %v283_v10 }
  0xa3   :  { %v175_v24 = vpop.f32.mrf.mxu0 }
  0xa4   :  { %548 = vmatmul.msk.f32.vlgmr.msra.gmra.mxu1 %vm133_vm0, %v175_v24 }
  0xa9   :  { %v190_v29 = vpop.f32.mrf.mxu2 }
  0xab   :  { %v178_v25 = vpop.f32.mrf.mxu0 }
  0xac   :  { %549 = vmatmul.msk.f32.gmra.mxu1 %vm133_vm0, %v178_v25  ;;  %v607_v25 = vld [vmem:[%s968_s5] ss:$0 sm:$0xff] }
  0xb1   :  { %v193_v30 = vpop.f32.mrf.mxu2 }
  0xb3   :  { %v181_v26 = vpop.f32.mrf.mxu0 }
  0xb4   :  { %550 = vmatmul.msk.f32.gmra.mxu1 %vm133_vm0, %v181_v26 }
  0xb9   :  { %v196_v31 = vpop.f32.mrf.mxu2 }
  0xbb   :  { %v184_v27 = vpop.f32.mrf.mxu0 }
  0xbc   :  { %551 = vmatmul.msk.f32.gmra.mxu1 %vm133_vm0, %v184_v27 }
  0xc3   :  { %v187_v28 = vpop.f32.mrf.mxu0 }
  0xc4   :  { %552 = vmatmul.msk.f32.vlgmr.msra.gmra.mxu3 %vm133_vm0, %v187_v28 }
  0xcc   :  { %553 = vmatmul.msk.f32.gmra.mxu3 %vm133_vm0, %v190_v29 }
  0xd4   :  { %554 = vmatmul.msk.f32.gmra.mxu3 %vm133_vm0, %v193_v30 }
  0xdc   :  { %555 = vmatmul.msk.f32.gmra.mxu3 %vm133_vm0, %v196_v31 }
 0x121   :  { %v243_v33 = vpop.f32.mrf.mxu1 }
 0x122   :  { %v244_v34 = vadd.f32 %v606_v32, %v243_v33 }
 0x124   :  { %609 = vtanh.f32 %v244_v34 }
 0x129   :  { %v246_v35 = vpop.f32.mrf.mxu1 }
 0x12a   :  { %v610_v36 = vpop.eup %609  ;;  %v247_v37 = vadd.f32 %v606_v32, %v246_v35 }
 0x12b   :  { %275 = vst [vmem:[#allocation11] sm:$0xff] %v610_v36 }
 0x12c   :  { %611 = vtanh.f32 %v247_v37 }
 0x131   :  { %v249_v38 = vpop.f32.mrf.mxu1 }
 0x132   :  { %v612_v39 = vpop.eup %611  ;;  %v250_v40 = vadd.f32 %v606_v32, %v249_v38 }
 0x133   :  { %276 = vst [vmem:[#allocation11 + $0x18] sm:$0xff] %v612_v39 }
 0x134   :  { %613 = vtanh.f32 %v250_v40 }
 0x139   :  { %v252_v41 = vpop.f32.mrf.mxu1 }
 0x13a   :  { %v614_v42 = vpop.eup %613  ;;  %v253_v43 = vadd.f32 %v606_v32, %v252_v41 }
 0x13b   :  { %277 = vst [vmem:[#allocation11 + $0x30] sm:$0xff] %v614_v42 }
 0x13c   :  { %615 = vtanh.f32 %v253_v43 }
 0x142   :  { %v616_v44 = vpop.eup %615 }
 0x143   :  { %278 = vst [vmem:[#allocation11 + $0x48] sm:$0xff] %v616_v44 }
 0x147   :  { %v255_v45 = vpop.f32.mrf.mxu3 }
 0x148   :  { %v256_v46 = vadd.f32 %v606_v32, %v255_v45 }
 0x14a   :  { %617 = vtanh.f32 %v256_v46 }
 0x14f   :  { %v258_v47 = vpop.f32.mrf.mxu3 }
 0x150   :  { %v618_v48 = vpop.eup %617  ;;  %v259_v49 = vadd.f32 %v606_v32, %v258_v47 }
 0x151   :  { %279 = vst [vmem:[#allocation11 + $0x60] sm:$0xff] %v618_v48 }
 0x152   :  { %619 = vtanh.f32 %v259_v49 }
 0x157   :  { %v261_v50 = vpop.f32.mrf.mxu3 }
 0x158   :  { %v620_v51 = vpop.eup %619  ;;  %v262_v52 = vadd.f32 %v606_v32, %v261_v50  ;;  %v416_v50 = vld [vmem:[#allocation10 + $0x78] sm:$0xff] }
 0x159   :  { %280 = vst [vmem:[#allocation11 + $0x78] sm:$0xff] %v620_v51  ;;  %462 = vmatpush.msrb.mxu1 %v416_v50 }
 0x15a   :  { %621 = vtanh.f32 %v262_v52  ;;  %v414_v52 = vld [vmem:[#allocation10 + $0x68] sm:$0xff] }
 0x15f   :  { %v264_v53 = vpop.f32.mrf.mxu3 }
 0x160   :  { %v622_v54 = vpop.eup %621  ;;  %v265_v55 = vadd.f32 %v606_v32, %v264_v53  ;;  %v413_v53 = vld [vmem:[#allocation10 + $0x60] sm:$0xff] }
 0x161   :  { %281 = vst [vmem:[#allocation11 + $0x90] sm:$0xff] %v622_v54 }
 0x162   :  { %623 = vtanh.f32 %v265_v55  ;;  %v408_v55 = vld [vmem:[#allocation10 + $0x38] sm:$0xff] }
 0x168   :  { %v624_v56 = vpop.eup %623 }
 0x169   :  { %282 = vst [vmem:[#allocation11 + $0xa8] sm:$0xff] %v624_v56  ;;  %308 = vmatpush.msrb.mxu2 %v624_v56  ;;  %v406_v56 = vld [vmem:[#allocation10 + $0x28] sm:$0xff] }
 0x16b   :  { %309 = vmatpush.msrb.mxu2 %v622_v54  ;;  %v412_v54 = vld [vmem:[#allocation10 + $0x58] sm:$0xff] }
 0x16d   :  { %310 = vmatpush.msrb.mxu2 %v620_v51  ;;  %v415_v51 = vld [vmem:[#allocation10 + $0x70] sm:$0xff] }
 0x16e   :  { %463 = vmatpush.msrb.mxu1 %v415_v51 }
 0x16f   :  { %311 = vmatpush.msrb.mxu2 %v618_v48 }
 0x170   :  { %464 = vmatpush.msrb.mxu1 %v414_v52 }
 0x171   :  { %312 = vmatpush.msrb.mxu2 %v616_v44 }
 0x172   :  { %465 = vmatpush.msrb.mxu1 %v413_v53 }
 0x173   :  { %313 = vmatpush.msrb.mxu2 %v614_v42 }
 0x174   :  { %466 = vmatpush.msrb.mxu1 %v412_v54 }
 0x175   :  { %314 = vmatpush.msrb.mxu2 %v612_v39 }
 0x177   :  { %315 = vmatpush.msrb.mxu2 %v610_v36 }
 0x178   :  { %556 = vmatmul.msk.f32.vlgmr.msrb.gmra.mxu2 %vm133_vm0, %v879_v8 }
 0x180   :  { %557 = vmatmul.msk.f32.gmra.mxu2 %vm133_vm0, %v887_v13 }
 0x188   :  { %558 = vmatmul.msk.f32.gmra.mxu2 %vm133_vm0, %v895_v19 }
 0x190   :  { %559 = vmatmul.msk.f32.gmra.mxu2 %vm133_vm0, %v903_v21 }
 0x198   :  { %560 = vmatmul.msk.f32.gmra.mxu2 %vm133_vm0, %v907_v22 }
 0x1a0   :  { %561 = vmatmul.msk.f32.gmra.mxu2 %vm133_vm0, %v883_v9 }
 0x1a8   :  { %562 = vmatmul.msk.f32.gmra.mxu2 %vm133_vm0, %v889_v15 }
 0x1b0   :  { %563 = vmatmul.msk.f32.gmra.mxu2 %vm133_vm0, %v897_v20 }
 0x1fb   :  { %v317_v11 = vpop.f32.mrf.mxu2 }
 0x1fc   :  { %360 = vmatmul.f32.vlgmr.msrb.gmra.mxu3 %v317_v11 }
 0x203   :  { %v320_v12 = vpop.f32.mrf.mxu2 }
 0x204   :  { %363 = vmatmul.f32.gmra.mxu3 %v320_v12 }
 0x20b   :  { %v323_v14 = vpop.f32.mrf.mxu2 }
 0x20c   :  { %366 = vmatmul.f32.gmra.mxu3 %v323_v14 }
 0x213   :  { %v326_v16 = vpop.f32.mrf.mxu2 }
 0x214   :  { %369 = vmatmul.f32.gmra.mxu3 %v326_v16 }
 0x21b   :  { %v329_v17 = vpop.f32.mrf.mxu2 }
 0x21c   :  { %372 = vmatmul.f32.gmra.mxu3 %v329_v17 }
 0x223   :  { %v332_v18 = vpop.f32.mrf.mxu2 }
 0x224   :  { %375 = vmatmul.f32.gmra.mxu3 %v332_v18 }
 0x22b   :  { %v335_v23 = vpop.f32.mrf.mxu2 }
 0x22c   :  { %378 = vmatmul.f32.gmra.mxu3 %v335_v23 }
 0x233   :  { %v338_v24 = vpop.f32.mrf.mxu2 }
 0x234   :  { %381 = vmatmul.f32.gmra.mxu3 %v338_v24 }
 0x27f   :  { %v361_v26 = vpop.f32.mrf.mxu3 }
 0x280   :  { %v362_v27 = vadd.f32 %v607_v25, %v361_v26 }
 0x282   :  { %625 = vtanh.f32 %v362_v27 }
 0x287   :  { %v364_v28 = vpop.f32.mrf.mxu3 }
 0x288   :  { %v626_v29 = vpop.eup %625  ;;  %v365_v30 = vadd.f32 %v607_v25, %v364_v28 }
 0x289   :  { %393 = vst [vmem:[#allocation11 + $0x8] sm:$0xff] %v626_v29 }
 0x28a   :  { %627 = vtanh.f32 %v365_v30 }
 0x28f   :  { %v367_v31 = vpop.f32.mrf.mxu3 }
 0x290   :  { %v628_v32 = vpop.eup %627  ;;  %v368_v33 = vadd.f32 %v607_v25, %v367_v31 }
 0x291   :  { %394 = vst [vmem:[#allocation11 + $0x20] sm:$0xff] %v628_v32 }
 0x292   :  { %629 = vtanh.f32 %v368_v33 }
 0x297   :  { %v370_v34 = vpop.f32.mrf.mxu3 }
 0x298   :  { %v630_v35 = vpop.eup %629  ;;  %v371_v36 = vadd.f32 %v607_v25, %v370_v34 }
 0x299   :  { %395 = vst [vmem:[#allocation11 + $0x38] sm:$0xff] %v630_v35 }
 0x29a   :  { %631 = vtanh.f32 %v371_v36 }
 0x29f   :  { %v373_v37 = vpop.f32.mrf.mxu3 }
 0x2a0   :  { %v632_v38 = vpop.eup %631  ;;  %v374_v39 = vadd.f32 %v607_v25, %v373_v37 }
 0x2a1   :  { %396 = vst [vmem:[#allocation11 + $0x50] sm:$0xff] %v632_v38 }
 0x2a2   :  { %633 = vtanh.f32 %v374_v39 }
 0x2a7   :  { %v376_v40 = vpop.f32.mrf.mxu3 }
 0x2a8   :  { %v634_v41 = vpop.eup %633  ;;  %v377_v42 = vadd.f32 %v607_v25, %v376_v40 }
 0x2a9   :  { %397 = vst [vmem:[#allocation11 + $0x68] sm:$0xff] %v634_v41 }
 0x2aa   :  { %635 = vtanh.f32 %v377_v42 }
 0x2af   :  { %v379_v43 = vpop.f32.mrf.mxu3 }
 0x2b0   :  { %v636_v44 = vpop.eup %635  ;;  %v380_v45 = vadd.f32 %v607_v25, %v379_v43 }
 0x2b1   :  { %398 = vst [vmem:[#allocation11 + $0x80] sm:$0xff] %v636_v44 }
 0x2b2   :  { %637 = vtanh.f32 %v380_v45 }
 0x2b7   :  { %v382_v46 = vpop.f32.mrf.mxu3 }
 0x2b8   :  { %v638_v47 = vpop.eup %637  ;;  %v383_v48 = vadd.f32 %v607_v25, %v382_v46 }
 0x2b9   :  { %399 = vst [vmem:[#allocation11 + $0x98] sm:$0xff] %v638_v47 }
 0x2ba   :  { %639 = vtanh.f32 %v383_v48 }
 0x2c0   :  { %v640_v49 = vpop.eup %639 }
 0x2c1   :  { %400 = vst [vmem:[#allocation11 + $0xb0] sm:$0xff] %v640_v49  ;;  %426 = vmatpush.msrb.mxu0 %v640_v49  ;;  %588 = vmatpush.msra.mxu2 %v640_v49 }
 0x2c3   :  { %427 = vmatpush.msrb.mxu0 %v638_v47  ;;  %589 = vmatpush.msra.mxu2 %v638_v47 }
 0x2c5   :  { %428 = vmatpush.msrb.mxu0 %v636_v44  ;;  %590 = vmatpush.msra.mxu2 %v636_v44 }
 0x2c7   :  { %429 = vmatpush.msrb.mxu0 %v634_v41  ;;  %591 = vmatpush.msra.mxu2 %v634_v41 }
 0x2c9   :  { %430 = vmatpush.msrb.mxu0 %v632_v38  ;;  %592 = vmatpush.msra.mxu2 %v632_v38 }
 0x2cb   :  { %431 = vmatpush.msrb.mxu0 %v630_v35  ;;  %593 = vmatpush.msra.mxu2 %v630_v35 }
 0x2cd   :  { %432 = vmatpush.msrb.mxu0 %v628_v32  ;;  %594 = vmatpush.msra.mxu2 %v628_v32 }
 0x2cf   :  { %433 = vmatpush.msrb.mxu0 %v626_v29  ;;  %595 = vmatpush.msra.mxu2 %v626_v29 }
 0x2d0   :  { %564 = vmatmul.msk.f32.vlgmr.msrb.gmra.mxu0 %vm133_vm0, %v879_v8  ;;  %571 = vmatmul.msk.f32.vlgmr.msra.gmra.mxu2 %vm133_vm0, %v897_v20  ;;  %v411_v8 = vld [vmem:[#allocation10 + $0x50] sm:$0xff]  ;;  %v410_v20 = vld [vmem:[#allocation10 + $0x48] sm:$0xff] }
 0x2d1   :  { %467 = vmatpush.msrb.mxu1 %v411_v8 }
 0x2d3   :  { %468 = vmatpush.msrb.mxu1 %v410_v20 }
 0x2d8   :  { %565 = vmatmul.msk.f32.gmra.mxu0 %vm133_vm0, %v887_v13  ;;  %v409_v13 = vld [vmem:[#allocation10 + $0x40] sm:$0xff] }
 0x2d9   :  { %469 = vmatpush.msrb.mxu1 %v409_v13 }
 0x2db   :  { %470 = vmatpush.msrb.mxu1 %v408_v55 }
 0x2e0   :  { %566 = vmatmul.msk.f32.gmra.mxu0 %vm133_vm0, %v895_v19  ;;  %v407_v19 = vld [vmem:[#allocation10 + $0x30] sm:$0xff] }
 0x2e1   :  { %471 = vmatpush.msrb.mxu1 %v407_v19 }
 0x2e3   :  { %472 = vmatpush.msrb.mxu1 %v406_v56 }
 0x2e5   :  { %473 = vmatpush.msrb.mxu1 %v405_v57 }
 0x2e7   :  { %474 = vmatpush.msrb.mxu1 %v404_v58 }
 0x2e8   :  { %567 = vmatmul.msk.f32.gmra.mxu0 %vm133_vm0, %v903_v21  ;;  %v403_v21 = vld [vmem:[#allocation10 + $0x10] sm:$0xff] }
 0x2e9   :  { %475 = vmatpush.msrb.mxu1 %v403_v21 }
 0x2eb   :  { %476 = vmatpush.msrb.mxu1 %v402_v59 }
 0x2ed   :  { %477 = vmatpush.msrb.mxu1 %v401_v60 }
 0x2f0   :  { %568 = vmatmul.msk.f32.gmra.mxu0 %vm133_vm0, %v907_v22 }
 0x2f8   :  { %569 = vmatmul.msk.f32.gmra.mxu0 %vm133_vm0, %v883_v9 }
 0x300   :  { %570 = vmatmul.msk.f32.gmra.mxu0 %vm133_vm0, %v889_v15  ;;  %v608_v15 = vld [vmem:[%s970_s7] ss:$0 sm:$0xff]  ;;  %s816_s7 = smov [#allocation11]  }
 0x301   :  { %s523_s9 = sshll.u32 %s816_s7, 4  ;;  %s524_s9 = int_to_ptr.vmem [resolvable:$true] %s523_s9 }
 0x34d   :  { %v435_v22 = vpop.f32.mrf.mxu0 }
 0x34e   :  { %478 = vmatmul.f32.vlgmr.msrb.gmra.mxu1 %v435_v22 }
 0x353   :  { %v456_v2 = vpop.f32.mrf.mxu2 }
 0x355   :  { %v438_v61 = vpop.f32.mrf.mxu0 }
 0x356   :  { %481 = vmatmul.f32.gmra.mxu1 %v438_v61 }
 0x35d   :  { %v441_v62 = vpop.f32.mrf.mxu0 }
 0x35e   :  { %484 = vmatmul.f32.gmra.mxu1 %v441_v62 }
 0x365   :  { %v444_v63 = vpop.f32.mrf.mxu0 }
 0x366   :  { %487 = vmatmul.f32.gmra.mxu1 %v444_v63 }
 0x36d   :  { %v447_v0 = vpop.f32.mrf.mxu0 }
 0x36e   :  { %490 = vmatmul.f32.gmra.mxu1 %v447_v0 }
 0x375   :  { %v450_v9 = vpop.f32.mrf.mxu0 }
 0x376   :  { %493 = vmatmul.f32.gmra.mxu1 %v450_v9 }
 0x37d   :  { %v453_v1 = vpop.f32.mrf.mxu0 }
 0x37e   :  { %496 = vmatmul.f32.gmra.mxu1 %v453_v1 }
 0x386   :  { %499 = vmatmul.f32.gmra.mxu1 %v456_v2 }
 0x3cb   :  { %v479_v3 = vpop.f32.mrf.mxu1 }
 0x3cc   :  { %v480_v4 = vadd.f32 %v608_v15, %v479_v3 }
 0x3ce   :  { %641 = vtanh.f32 %v480_v4 }
 0x3d3   :  { %v482_v5 = vpop.f32.mrf.mxu1 }
 0x3d4   :  { %v642_v6 = vpop.eup %641  ;;  %v483_v7 = vadd.f32 %v608_v15, %v482_v5 }
 0x3d5   :  { %511 = vst [vmem:[#allocation11 + $0x10] sm:$0xff] %v642_v6 }
 0x3d6   :  { %643 = vtanh.f32 %v483_v7 }
 0x3db   :  { %v485_v10 = vpop.f32.mrf.mxu1 }
 0x3dc   :  { %v644_v11 = vpop.eup %643  ;;  %v486_v12 = vadd.f32 %v608_v15, %v485_v10 }
 0x3dd   :  { %512 = vst [vmem:[#allocation11 + $0x28] sm:$0xff] %v644_v11 }
 0x3de   :  { %645 = vtanh.f32 %v486_v12 }
 0x3e3   :  { %v488_v14 = vpop.f32.mrf.mxu1 }
 0x3e4   :  { %v646_v16 = vpop.eup %645  ;;  %v489_v17 = vadd.f32 %v608_v15, %v488_v14 }
 0x3e5   :  { %513 = vst [vmem:[#allocation11 + $0x40] sm:$0xff] %v646_v16 }
 0x3e6   :  { %647 = vtanh.f32 %v489_v17 }
 0x3eb   :  { %v491_v18 = vpop.f32.mrf.mxu1 }
 0x3ec   :  { %v648_v23 = vpop.eup %647  ;;  %v492_v24 = vadd.f32 %v608_v15, %v491_v18 }
 0x3ed   :  { %514 = vst [vmem:[#allocation11 + $0x58] sm:$0xff] %v648_v23 }
 0x3ee   :  { %649 = vtanh.f32 %v492_v24 }
 0x3f3   :  { %v494_v25 = vpop.f32.mrf.mxu1 }
 0x3f4   :  { %v650_v26 = vpop.eup %649  ;;  %v495_v27 = vadd.f32 %v608_v15, %v494_v25 }
 0x3f5   :  { %515 = vst [vmem:[#allocation11 + $0x70] sm:$0xff] %v650_v26 }
 0x3f6   :  { %651 = vtanh.f32 %v495_v27 }
 0x3fb   :  { %v497_v28 = vpop.f32.mrf.mxu1 }
 0x3fc   :  { %v652_v29 = vpop.eup %651  ;;  %v498_v30 = vadd.f32 %v608_v15, %v497_v28 }
 0x3fd   :  { %516 = vst [vmem:[#allocation11 + $0x88] sm:$0xff] %v652_v29 }
 0x3fe   :  { %653 = vtanh.f32 %v498_v30 }
 0x403   :  { %v500_v31 = vpop.f32.mrf.mxu1 }
 0x404   :  { %v654_v32 = vpop.eup %653  ;;  %v501_v33 = vadd.f32 %v608_v15, %v500_v31 }
 0x405   :  { %517 = vst [vmem:[#allocation11 + $0xa0] sm:$0xff] %v654_v32 }
 0x406   :  { %655 = vtanh.f32 %v501_v33 }
 0x40c   :  { %v656_v34 = vpop.eup %655 }
 0x40d   :  { %518 = vst [vmem:[#allocation11 + $0xb8] sm:$0xff] %v656_v34 }
 0x40e   :  { %531 = dma.vmem_to_hbm [thread:$0]  %s524_s9, 3072, %s526_s12, [#allocation4], %s817_s13, %s817_s13, %s818_s14  }
 0x40f   :  { %807 = dma.done.wait [#allocation4], 3072  }
 0x410   :  { %808 = vsyncadd [#allocation4], 4294964224 }
 0x411   :  { %536 = vsyncpa [#allocation3], 1 }
 0x412   :  { %537 = vsyncpa [#allocation6], 1 }
 0x413   :  { %538 = vsyncpa [#allocation9], 1 }
 0x414   :  { %539 = vsyncpa [#allocation4], 1 }

</bundles_post_ra>
